<compile_context>
chip_gen: v6e
topology: v6e:2x2x1
jax: 0.10.0
libtpu: 0.0.40
codegen_flags: <defaults>
</compile_context>

<pallas_src>
import jax
import jax.numpy as jnp
from jax.experimental import pallas as pl
from jax.experimental.pallas import tpu as pltpu

PAD = 128          # padded lane width for every layer
IN_FEATURES = 96   # 32 time steps * 3 axes
NUM_CLASSES = 3


def _round_up(n, m):
    return ((n + m - 1) // m) * m


def _mlp_kernel(x_ref, w1_ref, b1_ref, w2_ref, b2_ref,
                w3_ref, b3_ref, w4_ref, b4_ref, o_ref):
    # x_ref: (TB, 128) bf16; w*_ref: (128, 128) bf16; b*_ref: (1, 128) f32.
    x = x_ref[...]
    h = jnp.dot(x, w1_ref[...], preferred_element_type=jnp.float32)
    h = jnp.maximum(h + b1_ref[...], 0.0).astype(jnp.bfloat16)
    h = jnp.dot(h, w2_ref[...], preferred_element_type=jnp.float32)
    h = jnp.maximum(h + b2_ref[...], 0.0).astype(jnp.bfloat16)
    h = jnp.dot(h, w3_ref[...], preferred_element_type=jnp.float32)
    h = jnp.maximum(h + b3_ref[...], 0.0).astype(jnp.bfloat16)
    out = jnp.dot(h, w4_ref[...], preferred_element_type=jnp.float32)
    o_ref[...] = out + b4_ref[...]           # lane-dense (TB, 128) f32 store


@jax.jit
def imu_classifier_forward(x, params):
    """x: (B, 32, 3) float32 -> logits (B, 3) float32."""
    B = x.shape[0]
    x2d = x.reshape(B, IN_FEATURES).astype(jnp.bfloat16)
    x2d = jnp.pad(x2d, ((0, 0), (0, PAD - IN_FEATURES)))      # 96 -> 128 lanes

    # Batch tiling: TB capped at 256 (fills the 256-wide MXU M axis on
    # v6e/v7x); batch padded to a multiple of TB so there are no partial tiles.
    TB = min(256, _round_up(B, 8))
    Bp = _round_up(B, TB)
    if Bp != B:
        x2d = jnp.pad(x2d, ((0, Bp - B), (0, 0)))
    num_tiles = Bp // TB

    (w1, b1), (w2, b2), (w3, b3), (w4, b4) = params
    args = (x2d, w1, b1, w2, b2, w3, b3, w4, b4)

    if num_tiles >= 3:
        # Extra buffering on the streamed input helps hide DMA on v5e's
        # lower HBM bandwidth; only meaningful with several tiles in flight.
        x_spec = pl.BlockSpec((TB, PAD), lambda i: (i, 0),
                              pipeline_mode=pl.Buffered(3))
    else:
        x_spec = pl.BlockSpec((TB, PAD), lambda i: (i, 0))

    # Constant index maps -> weights/biases stay resident in VMEM across steps.
    w_spec = pl.BlockSpec((PAD, PAD), lambda i: (0, 0))
    b_spec = pl.BlockSpec((1, PAD), lambda i: (0, 0))

    out_padded = pl.pallas_call(
        _mlp_kernel,
        out_shape=jax.ShapeDtypeStruct((Bp, PAD), jnp.float32),
        grid_spec=pltpu.PrefetchScalarGridSpec(
            num_scalar_prefetch=0,
            grid=(num_tiles,),
            in_specs=[x_spec,
                      w_spec, b_spec, w_spec, b_spec,
                      w_spec, b_spec, w_spec, b_spec],
            out_specs=pl.BlockSpec((TB, PAD), lambda i: (i, 0)),
        ),
        compiler_params=pltpu.CompilerParams(
            dimension_semantics=("parallel",)),   # megacore sharding on v7x
    )(*args)

    return out_padded[:B, :NUM_CLASSES]


def init_params(key):
    """torch.nn.Linear-style init; weights stored as (in, out) == torch weight.T,
    zero-padded to (128, 128) bf16; biases zero-padded to (1, 128) f32."""
    dims = [(IN_FEATURES, 64), (64, 128), (128, 64), (64, NUM_CLASSES)]
    params = []
    for din, dout in dims:
        key, kw, kb = jax.random.split(key, 3)
        bound = 1.0 / float(din) ** 0.5
        w = jax.random.uniform(kw, (din, dout), jnp.float32, -bound, bound)
        b = jax.random.uniform(kb, (1, dout), jnp.float32, -bound, bound)
        wp = jnp.zeros((PAD, PAD), jnp.float32).at[:din, :dout].set(w)
        bp = jnp.zeros((1, PAD), jnp.float32).at[:, :dout].set(b)
        params.append((wp.astype(jnp.bfloat16), bp))
    return params


def reference_forward(x, params):
    """Pure-JAX reference mirroring the kernel math (bf16 operands, f32 accum)."""
    B = x.shape[0]
    h = x.reshape(B, IN_FEATURES).astype(jnp.bfloat16)
    h = jnp.pad(h, ((0, 0), (0, PAD - IN_FEATURES)))
    (w1, b1), (w2, b2), (w3, b3), (w4, b4) = params
    h = jnp.maximum(jnp.dot(h, w1, preferred_element_type=jnp.float32) + b1,
                    0.0).astype(jnp.bfloat16)
    h = jnp.maximum(jnp.dot(h, w2, preferred_element_type=jnp.float32) + b2,
                    0.0).astype(jnp.bfloat16)
    h = jnp.maximum(jnp.dot(h, w3, preferred_element_type=jnp.float32) + b3,
                    0.0).astype(jnp.bfloat16)
    out = jnp.dot(h, w4, preferred_element_type=jnp.float32) + b4
    return out[:, :NUM_CLASSES]


if __name__ == "__main__":
    key = jax.random.PRNGKey(0)
    key, kx = jax.random.split(key)
    # IMU input: batch=2, 32 time steps x 3 axes -> flattened to 96 features
    x = jax.random.normal(kx, (2, 32, 3), jnp.float32)

    params = init_params(key)

    out = imu_classifier_forward(x, params)
    out = jax.block_until_ready(out)

    ref = reference_forward(x, params)
    assert out.shape == (2, NUM_CLASSES)
    assert jnp.allclose(out, ref, atol=1e-2, rtol=1e-2), "mismatch vs reference"
    print("KERNEL_OK")
</pallas_src>

<mosaic_0001>
module attributes {stable_mosaic.version = 11 : i64} {
  func.func @_mlp_kernel(%arg0: i32, %arg1: memref<8x128xbf16, #tpu.memory_space<vmem>>, %arg2: memref<128x128xbf16, #tpu.memory_space<vmem>>, %arg3: memref<1x128xf32, #tpu.memory_space<vmem>>, %arg4: memref<128x128xbf16, #tpu.memory_space<vmem>>, %arg5: memref<1x128xf32, #tpu.memory_space<vmem>>, %arg6: memref<128x128xbf16, #tpu.memory_space<vmem>>, %arg7: memref<1x128xf32, #tpu.memory_space<vmem>>, %arg8: memref<128x128xbf16, #tpu.memory_space<vmem>>, %arg9: memref<1x128xf32, #tpu.memory_space<vmem>>, %arg10: memref<8x128xf32, #tpu.memory_space<vmem>>) attributes {dimension_semantics = [#tpu.dimension_semantics<parallel>], iteration_bounds = array<i64: 1>, scalar_prefetch = 0 : i64, scratch_operands = 0 : i64, tpu.core_type = #tpu.core_type<tc>, window_params = [{transform_indices = @transform_0, window_bounds = array<i64: 8, 128>}, {pipeline_mode = #tpu.pipeline_mode<synchronous>, transform_indices = @transform_1, window_bounds = array<i64: 128, 128>}, {pipeline_mode = #tpu.pipeline_mode<synchronous>, transform_indices = @transform_2, window_bounds = array<i64: 1, 128>}, {pipeline_mode = #tpu.pipeline_mode<synchronous>, transform_indices = @transform_3, window_bounds = array<i64: 128, 128>}, {pipeline_mode = #tpu.pipeline_mode<synchronous>, transform_indices = @transform_4, window_bounds = array<i64: 1, 128>}, {pipeline_mode = #tpu.pipeline_mode<synchronous>, transform_indices = @transform_5, window_bounds = array<i64: 128, 128>}, {pipeline_mode = #tpu.pipeline_mode<synchronous>, transform_indices = @transform_6, window_bounds = array<i64: 1, 128>}, {pipeline_mode = #tpu.pipeline_mode<synchronous>, transform_indices = @transform_7, window_bounds = array<i64: 128, 128>}, {pipeline_mode = #tpu.pipeline_mode<synchronous>, transform_indices = @transform_8, window_bounds = array<i64: 1, 128>}, {transform_indices = @transform_9, window_bounds = array<i64: 8, 128>}]} {
    %c0 = arith.constant 0 : index
    %c0_0 = arith.constant 0 : index
    %0 = vector.load %arg1[%c0, %c0_0] : memref<8x128xbf16, #tpu.memory_space<vmem>>, vector<8x128xbf16>
    %c0_1 = arith.constant 0 : index
    %c0_2 = arith.constant 0 : index
    %1 = vector.load %arg2[%c0_1, %c0_2] : memref<128x128xbf16, #tpu.memory_space<vmem>>, vector<128x128xbf16>
    %cst = arith.constant dense<0.000000e+00> : vector<8x128xf32>
    %2 = tpu.matmul %0, %1, %cst {dimension_numbers = #tpu.dot_dimension_numbers<[1], [0], [0], [1], [0, 0, 1, 1], [], []>} : vector<8x128xbf16>, vector<128x128xbf16>, vector<8x128xf32> -> vector<8x128xf32>
    %c0_3 = arith.constant 0 : index
    %c0_4 = arith.constant 0 : index
    %3 = vector.load %arg3[%c0_3, %c0_4] : memref<1x128xf32, #tpu.memory_space<vmem>>, vector<1x128xf32>
    %4 = vector.broadcast %3 : vector<1x128xf32> to vector<8x128xf32>
    %5 = arith.addf %2, %4 : vector<8x128xf32>
    %cst_5 = arith.constant 0.000000e+00 : f32
    %6 = vector.broadcast %cst_5 : f32 to vector<8x128xf32>
    %7 = arith.maximumf %5, %6 : vector<8x128xf32>
    %8 = arith.truncf %7 : vector<8x128xf32> to vector<8x128xbf16>
    %c0_6 = arith.constant 0 : index
    %c0_7 = arith.constant 0 : index
    %9 = vector.load %arg4[%c0_6, %c0_7] : memref<128x128xbf16, #tpu.memory_space<vmem>>, vector<128x128xbf16>
    %cst_8 = arith.constant dense<0.000000e+00> : vector<8x128xf32>
    %10 = tpu.matmul %8, %9, %cst_8 {dimension_numbers = #tpu.dot_dimension_numbers<[1], [0], [0], [1], [0, 0, 1, 1], [], []>} : vector<8x128xbf16>, vector<128x128xbf16>, vector<8x128xf32> -> vector<8x128xf32>
    %c0_9 = arith.constant 0 : index
    %c0_10 = arith.constant 0 : index
    %11 = vector.load %arg5[%c0_9, %c0_10] : memref<1x128xf32, #tpu.memory_space<vmem>>, vector<1x128xf32>
    %12 = vector.broadcast %11 : vector<1x128xf32> to vector<8x128xf32>
    %13 = arith.addf %10, %12 : vector<8x128xf32>
    %cst_11 = arith.constant 0.000000e+00 : f32
    %14 = vector.broadcast %cst_11 : f32 to vector<8x128xf32>
    %15 = arith.maximumf %13, %14 : vector<8x128xf32>
    %16 = arith.truncf %15 : vector<8x128xf32> to vector<8x128xbf16>
    %c0_12 = arith.constant 0 : index
    %c0_13 = arith.constant 0 : index
    %17 = vector.load %arg6[%c0_12, %c0_13] : memref<128x128xbf16, #tpu.memory_space<vmem>>, vector<128x128xbf16>
    %cst_14 = arith.constant dense<0.000000e+00> : vector<8x128xf32>
    %18 = tpu.matmul %16, %17, %cst_14 {dimension_numbers = #tpu.dot_dimension_numbers<[1], [0], [0], [1], [0, 0, 1, 1], [], []>} : vector<8x128xbf16>, vector<128x128xbf16>, vector<8x128xf32> -> vector<8x128xf32>
    %c0_15 = arith.constant 0 : index
    %c0_16 = arith.constant 0 : index
    %19 = vector.load %arg7[%c0_15, %c0_16] : memref<1x128xf32, #tpu.memory_space<vmem>>, vector<1x128xf32>
    %20 = vector.broadcast %19 : vector<1x128xf32> to vector<8x128xf32>
    %21 = arith.addf %18, %20 : vector<8x128xf32>
    %cst_17 = arith.constant 0.000000e+00 : f32
    %22 = vector.broadcast %cst_17 : f32 to vector<8x128xf32>
    %23 = arith.maximumf %21, %22 : vector<8x128xf32>
    %24 = arith.truncf %23 : vector<8x128xf32> to vector<8x128xbf16>
    %c0_18 = arith.constant 0 : index
    %c0_19 = arith.constant 0 : index
    %25 = vector.load %arg8[%c0_18, %c0_19] : memref<128x128xbf16, #tpu.memory_space<vmem>>, vector<128x128xbf16>
    %cst_20 = arith.constant dense<0.000000e+00> : vector<8x128xf32>
    %26 = tpu.matmul %24, %25, %cst_20 {dimension_numbers = #tpu.dot_dimension_numbers<[1], [0], [0], [1], [0, 0, 1, 1], [], []>} : vector<8x128xbf16>, vector<128x128xbf16>, vector<8x128xf32> -> vector<8x128xf32>
    %c0_21 = arith.constant 0 : index
    %c0_22 = arith.constant 0 : index
    %27 = vector.load %arg9[%c0_21, %c0_22] : memref<1x128xf32, #tpu.memory_space<vmem>>, vector<1x128xf32>
    %28 = vector.broadcast %27 : vector<1x128xf32> to vector<8x128xf32>
    %29 = arith.addf %26, %28 : vector<8x128xf32>
    %c0_23 = arith.constant 0 : index
    %c0_24 = arith.constant 0 : index
    %30 = vector.load %arg10[%c0_23, %c0_24] : memref<8x128xf32, #tpu.memory_space<vmem>>, vector<8x128xf32>
    tpu.vector_store %arg10[%c0_23, %c0_24], %29 {strides = array<i32>} : memref<8x128xf32, #tpu.memory_space<vmem>>, vector<8x128xf32>,
    return
  }
  func.func @transform_0(%arg0: i32) -> (i32, i32) {
    %c0_i32 = arith.constant 0 : i32
    %c0_i32_0 = arith.constant 0 : i32
    return %arg0, %c0_i32 : i32, i32
  }
  func.func @transform_1(%arg0: i32) -> (i32, i32) {
    %c0_i32 = arith.constant 0 : i32
    %c0_i32_0 = arith.constant 0 : i32
    %c0_i32_1 = arith.constant 0 : i32
    return %c0_i32, %c0_i32_0 : i32, i32
  }
  func.func @transform_2(%arg0: i32) -> (i32, i32) {
    %c0_i32 = arith.constant 0 : i32
    %c0_i32_0 = arith.constant 0 : i32
    %c0_i32_1 = arith.constant 0 : i32
    return %c0_i32, %c0_i32_0 : i32, i32
  }
  func.func @transform_3(%arg0: i32) -> (i32, i32) {
    %c0_i32 = arith.constant 0 : i32
    %c0_i32_0 = arith.constant 0 : i32
    %c0_i32_1 = arith.constant 0 : i32
    return %c0_i32, %c0_i32_0 : i32, i32
  }
  func.func @transform_4(%arg0: i32) -> (i32, i32) {
    %c0_i32 = arith.constant 0 : i32
    %c0_i32_0 = arith.constant 0 : i32
    %c0_i32_1 = arith.constant 0 : i32
    return %c0_i32, %c0_i32_0 : i32, i32
  }
  func.func @transform_5(%arg0: i32) -> (i32, i32) {
    %c0_i32 = arith.constant 0 : i32
    %c0_i32_0 = arith.constant 0 : i32
    %c0_i32_1 = arith.constant 0 : i32
    return %c0_i32, %c0_i32_0 : i32, i32
  }
  func.func @transform_6(%arg0: i32) -> (i32, i32) {
    %c0_i32 = arith.constant 0 : i32
    %c0_i32_0 = arith.constant 0 : i32
    %c0_i32_1 = arith.constant 0 : i32
    return %c0_i32, %c0_i32_0 : i32, i32
  }
  func.func @transform_7(%arg0: i32) -> (i32, i32) {
    %c0_i32 = arith.constant 0 : i32
    %c0_i32_0 = arith.constant 0 : i32
    %c0_i32_1 = arith.constant 0 : i32
    return %c0_i32, %c0_i32_0 : i32, i32
  }
  func.func @transform_8(%arg0: i32) -> (i32, i32) {
    %c0_i32 = arith.constant 0 : i32
    %c0_i32_0 = arith.constant 0 : i32
    %c0_i32_1 = arith.constant 0 : i32
    return %c0_i32, %c0_i32_0 : i32, i32
  }
  func.func @transform_9(%arg0: i32) -> (i32, i32) {
    %c0_i32 = arith.constant 0 : i32
    %c0_i32_0 = arith.constant 0 : i32
    return %arg0, %c0_i32 : i32, i32
  }
}

</mosaic_0001>

<bundles_post_ra>
// kernel: imu_classifier_forward.1
= control target key start
LH: loop header
LB: loop body
LE: loop exit
PB: predicated region body
PF: predicated region fallthrough
CT: control target
= control target key end

     0   :  { %14 = vsyncpa [#allocation3], 0  ;;  %s935_s0 = inlined_call_operand.vmem [shape: bf16[8,128], index: 0, kind: input, shape index: {}]   ;;  %s936_s1 = inlined_call_operand.vmem [shape: bf16[128,128], index: 1, kind: input, shape index: {}]   ;;  %s937_s2 = inlined_call_operand.vmem [shape: f32[1,128], index: 2, kind: input, shape index: {}]   ;;  %s938_s3 = inlined_call_operand.hbm [shape: bf16[128,128], index: 3, kind: input, shape index: {}]   ;;  %s939_s4 = inlined_call_operand.vmem [shape: f32[1,128], index: 4, kind: input, shape index: {}]   ;;  %s940_s5 = inlined_call_operand.hbm [shape: bf16[128,128], index: 5, kind: input, shape index: {}]   ;;  %s941_s6 = inlined_call_operand.vmem [shape: f32[1,128], index: 6, kind: input, shape index: {}]   ;;  %s942_s7 = inlined_call_operand.hbm [shape: bf16[128,128], index: 7, kind: input, shape index: {}]   ;;  %s943_s8 = inlined_call_operand.vmem [shape: f32[1,128], index: 8, kind: input, shape index: {}]   ;;  %s944_s9 = inlined_call_operand.vmem [shape: f32[8,128], index: 9, kind: output, shape index: {}]  }
   0x1   :  { %15 = vsyncpa [#allocation5], 0  ;;  %s787_s30 = smov [#allocation4]   ;;  %s788_s11 = smov [#allocation2]  }
   0x2   :  { %s41_s10 = sshll.u32 %s787_s30, 4  ;;  %s27_s12 = sshll.u32 %s788_s11, 4  ;;  %s42_s10 = int_to_ptr.vmem [resolvable:$true] %s41_s10  ;;  %s28_s12 = int_to_ptr.vmem [resolvable:$true] %s27_s12 }
   0x3   :  { %s731_s13 = scalar_lea.vmem %s42_s10, 1024  ;;  %p736_p1 = scmp.lt.s32.totalorder %s42_s10, %s42_s10 }
   0x4   :  { %p732_p0 = scmp.ne.s32.totalorder %s42_s10, %s731_s13  ;;  %p737_p2 = scmp.lt.s32.totalorder %s731_s13, %s731_s13 }
   0x6   :  { %p738_p3 = por %p737_p2, %p736_p1 }
   0x8   :  { %p739_p4 = pnand %p738_p3, %p732_p0 }
   0xa   :  { %742 = shalt.err (!%p739_p4)
}
   0xb   :  { %s789_s14 = smov 64   ;;  %s790_s15 = smov 4  }
   0xc   :  { %47 = dma.hbm_to_vmem [thread:$0]  %s940_s5, 1024, %s42_s10, [#allocation5], %s789_s14, %s789_s14, %s790_s15  }
   0xd   :  { %s751_s18 = scalar_lea.vmem %s28_s12, 1024  ;;  %p756_p6 = scmp.lt.s32.totalorder %s28_s12, %s28_s12 }
   0xe   :  { %p752_p5 = scmp.ne.s32.totalorder %s28_s12, %s751_s18  ;;  %p757_p7 = scmp.lt.s32.totalorder %s751_s18, %s751_s18 }
  0x10   :  { %p758_p8 = por %p757_p7, %p756_p6 }
  0x12   :  { %p759_p9 = pnand %p758_p8, %p752_p5 }
  0x14   :  { %762 = shalt.err (!%p759_p9)
}
  0x15   :  { %33 = dma.hbm_to_vmem [thread:$0]  %s938_s3, 1024, %s28_s12, [#allocation3], %s789_s14, %s789_s14, %s790_s15  }
  0x16   :  { %s791_s21 = smov [#allocation6]  }
  0x17   :  { %s55_s22 = sshll.u32 %s791_s21, 4  ;;  %s56_s22 = int_to_ptr.vmem [resolvable:$true] %s55_s22 }
  0x18   :  { %s771_s23 = scalar_lea.vmem %s56_s22, 1024  ;;  %p776_p11 = scmp.lt.s32.totalorder %s56_s22, %s56_s22 }
  0x19   :  { %p772_p10 = scmp.ne.s32.totalorder %s56_s22, %s771_s23  ;;  %p777_p12 = scmp.lt.s32.totalorder %s771_s23, %s771_s23 }
  0x1b   :  { %p778_p13 = por %p777_p12, %p776_p11 }
  0x1d   :  { %p779_p0 = pnand %p778_p13, %p772_p10 }
  0x1f   :  { %782 = shalt.err (!%p779_p0)
}
  0x20   :  { %61 = dma.hbm_to_vmem [thread:$0]  %s942_s7, 1024, %s56_s22, [#allocation5], %s789_s14, %s789_s14, %s790_s15  }
  0x21   :  { %783 = dma.done.wait [#allocation3], 1024  }
  0x22   :  { %784 = vsyncadd [#allocation3], 4294966272 }
  0x23   :  { %785 = dma.done.wait [#allocation5], 2048  }
  0x24   :  { %786 = vsyncadd [#allocation5], 4294965248  ;;  %v792_v0 = vmov 0.0   ;;  %vm793_vm0 = vmmov 0   ;;  %v691_v1 = vld [vmem:[%s936_s1 + $0x38] sm:$0xff]   ;;  %v692_v2 = vld [vmem:[%s936_s1 + $0x30] sm:$0xff]  }
  0x25   :  { %604 = vmatprep.subr.bf16.mxu0 %v792_v0  ;;  %620 = vmatprep.mubr.msk.bf16.mxu0 %vm793_vm0, %v792_v0  ;;  %v693_v3 = vld [vmem:[%s936_s1 + $0x28] sm:$0xff]   ;;  %v699_v4 = vld [vmem:[#allocation2 + $0x38] sm:$0xff]   ;;  %v694_v5 = vld [vmem:[%s936_s1 + $0x20] sm:$0xff]  }
  0x26   :  { %624 = vmatprep.subr.bf16.mxu1 %v792_v0  ;;  %640 = vmatprep.mubr.msk.bf16.mxu1 %vm793_vm0, %v792_v0  ;;  %v700_v6 = vld [vmem:[#allocation2 + $0x30] sm:$0xff]   ;;  %v695_v7 = vld [vmem:[%s936_s1 + $0x18] sm:$0xff]   ;;  %v701_v8 = vld [vmem:[#allocation2 + $0x28] sm:$0xff]  }
  0x27   :  { %605 = vmatpush3.bf16.msra.mxu0 %v691_v1  ;;  %625 = vmatpush3.bf16.msra.mxu1 %v699_v4  ;;  %v696_v9 = vld [vmem:[%s936_s1 + $0x10] sm:$0xff]   ;;  %v702_v10 = vld [vmem:[#allocation2 + $0x20] sm:$0xff]   ;;  %v697_v11 = vld [vmem:[%s936_s1 + $0x8] sm:$0xff]  }
  0x28   :  { %606 = vmatprep.subr.bf16.mxu0 %v792_v0  ;;  %626 = vmatprep.subr.bf16.mxu1 %v792_v0  ;;  %v703_v12 = vld [vmem:[#allocation2 + $0x18] sm:$0xff]   ;;  %v698_v13 = vld [vmem:[%s936_s1] sm:$0xff]   ;;  %v704_v14 = vld [vmem:[#allocation2 + $0x10] sm:$0xff]  }
  0x29   :  { %v74_v15 = vld [vmem:[%s935_s0] sm:$0xf]  ;;  %v705_v16 = vld [vmem:[#allocation2 + $0x8] sm:$0xff]   ;;  %v707_v18 = vld [vmem:[#allocation4 + $0x38] sm:$0xff]  }
  0x2a   :  { %v706_v17 = vld [vmem:[#allocation2] sm:$0xff]   ;;  %v708_v19 = vld [vmem:[#allocation4 + $0x30] sm:$0xff]   ;;  %v709_v20 = vld [vmem:[#allocation4 + $0x28] sm:$0xff]  }
  0x2b   :  { %607 = vmatpush3.bf16.msra.mxu0 %v692_v2  ;;  %627 = vmatpush3.bf16.msra.mxu1 %v700_v6  ;;  %v710_v21 = vld [vmem:[#allocation4 + $0x20] sm:$0xff]   ;;  %v711_v22 = vld [vmem:[#allocation4 + $0x18] sm:$0xff]   ;;  %v712_v23 = vld [vmem:[#allocation4 + $0x10] sm:$0xff]  }
  0x2c   :  { %608 = vmatprep.subr.bf16.mxu0 %v792_v0  ;;  %628 = vmatprep.subr.bf16.mxu1 %v792_v0  ;;  %v532_v24 = vld [vmem:[%s937_s2] ss:$0 sm:$0xff]  ;;  %v713_v32 = vld [vmem:[#allocation4 + $0x8] sm:$0xff]   ;;  %v715_v34 = vld [vmem:[#allocation6 + $0x38] sm:$0xff]  }
  0x2d   :  { %v714_v33 = vld [vmem:[#allocation4] sm:$0xff]   ;;  %v716_v35 = vld [vmem:[#allocation6 + $0x30] sm:$0xff]   ;;  %v717_v36 = vld [vmem:[#allocation6 + $0x28] sm:$0xff]  }
  0x2e   :  { %v718_v37 = vld [vmem:[#allocation6 + $0x20] sm:$0xff]   ;;  %v719_v38 = vld [vmem:[#allocation6 + $0x18] sm:$0xff]   ;;  %v720_v39 = vld [vmem:[#allocation6 + $0x10] sm:$0xff]  }
  0x2f   :  { %609 = vmatpush3.bf16.msra.mxu0 %v693_v3  ;;  %629 = vmatpush3.bf16.msra.mxu1 %v701_v8  ;;  %v541_v40 = vld [vmem:[%s939_s4] ss:$0 sm:$0xff]  ;;  %v721_v48 = vld [vmem:[#allocation6 + $0x8] sm:$0xff]  }
  0x30   :  { %610 = vmatprep.subr.bf16.mxu0 %v792_v0  ;;  %630 = vmatprep.subr.bf16.mxu1 %v792_v0  ;;  %v722_v49 = vld [vmem:[#allocation6] sm:$0xff]  }
  0x31   :  { %v550_v50 = vld [vmem:[%s941_s6] ss:$0 sm:$0xff] }
  0x32   :  { %v559_v58 = vld [vmem:[%s943_s8] ss:$0 sm:$0xff] }
  0x33   :  { %611 = vmatpush3.bf16.msra.mxu0 %v694_v5  ;;  %631 = vmatpush3.bf16.msra.mxu1 %v702_v10 }
  0x34   :  { %612 = vmatprep.subr.bf16.mxu0 %v792_v0  ;;  %632 = vmatprep.subr.bf16.mxu1 %v792_v0 }
  0x37   :  { %613 = vmatpush3.bf16.msra.mxu0 %v695_v7  ;;  %633 = vmatpush3.bf16.msra.mxu1 %v703_v12 }
  0x38   :  { %614 = vmatprep.subr.bf16.mxu0 %v792_v0  ;;  %634 = vmatprep.subr.bf16.mxu1 %v792_v0 }
  0x3b   :  { %615 = vmatpush3.bf16.msra.mxu0 %v696_v9  ;;  %635 = vmatpush3.bf16.msra.mxu1 %v704_v14 }
  0x3c   :  { %616 = vmatprep.subr.bf16.mxu0 %v792_v0  ;;  %636 = vmatprep.subr.bf16.mxu1 %v792_v0 }
  0x3f   :  { %617 = vmatpush3.bf16.msra.mxu0 %v697_v11  ;;  %637 = vmatpush3.bf16.msra.mxu1 %v705_v16 }
  0x40   :  { %618 = vmatprep.subr.bf16.mxu0 %v792_v0  ;;  %638 = vmatprep.subr.bf16.mxu1 %v792_v0 }
  0x43   :  { %619 = vmatpush3.bf16.msra.mxu0 %v698_v13  ;;  %639 = vmatpush3.bf16.msra.mxu1 %v706_v17 }
  0x44   :  { %644 = vmatprep.subr.bf16.mxu0 %v792_v0  ;;  %664 = vmatprep.subr.bf16.mxu1 %v792_v0 }
  0x46   :  { %621 = vmatmul.mubr.bf16.vlgmr.msra.gmra.mxu0 %v74_v15 }
  0x47   :  { %660 = vmatprep.mubr.msk.bf16.mxu0 %vm793_vm0, %v792_v0  ;;  %645 = vmatpush3.bf16.msra.mxu0 %v707_v18 }
  0x48   :  { %646 = vmatprep.subr.bf16.mxu0 %v792_v0 }
  0x4b   :  { %647 = vmatpush3.bf16.msra.mxu0 %v708_v19 }
  0x4c   :  { %648 = vmatprep.subr.bf16.mxu0 %v792_v0 }
  0x4f   :  { %649 = vmatpush3.bf16.msra.mxu0 %v709_v20 }
  0x50   :  { %650 = vmatprep.subr.bf16.mxu0 %v792_v0 }
  0x53   :  { %651 = vmatpush3.bf16.msra.mxu0 %v710_v21 }
  0x54   :  { %652 = vmatprep.subr.bf16.mxu0 %v792_v0 }
  0x57   :  { %653 = vmatpush3.bf16.msra.mxu0 %v711_v22 }
  0x58   :  { %654 = vmatprep.subr.bf16.mxu0 %v792_v0 }
  0x5b   :  { %655 = vmatpush3.bf16.msra.mxu0 %v712_v23 }
  0x5c   :  { %656 = vmatprep.subr.bf16.mxu0 %v792_v0 }
  0x5f   :  { %657 = vmatpush3.bf16.msra.mxu0 %v713_v32 }
  0x60   :  { %658 = vmatprep.subr.bf16.mxu0 %v792_v0 }
  0x63   :  { %659 = vmatpush3.bf16.msra.mxu0 %v714_v33 }
 0x106   :  { %v180_v25 = vpop.f32.mrf.mxu0 }
 0x107   :  { %v181_v26 = vadd.f32 %v532_v24, %v180_v25 }
 0x108   :  { %v622_v27 = vpop.f32.mrf.mxu0 }
 0x109   :  { %v186_v28 = vmax.f32 %v181_v26, 0.0 }
 0x10a   :  { %v183_v29 = vpop.f32.mrf.mxu0 }
 0x10b   :  { %v187_v30 = vpack.c.bf16 %v186_v28, %v186_v28 }
 0x10c   :  { %v623_v31 = vpop.f32.mrf.mxu0 }
 0x10d   :  { %641 = vmatmul.mubr.bf16.vlgmr.msra.gmra.mxu1 %v187_v30 }
 0x10e   :  { %680 = vmatprep.mubr.msk.bf16.mxu1 %vm793_vm0, %v792_v0  ;;  %665 = vmatpush3.bf16.msra.mxu1 %v715_v34 }
 0x10f   :  { %666 = vmatprep.subr.bf16.mxu1 %v792_v0 }
 0x112   :  { %667 = vmatpush3.bf16.msra.mxu1 %v716_v35 }
 0x113   :  { %668 = vmatprep.subr.bf16.mxu1 %v792_v0 }
 0x116   :  { %669 = vmatpush3.bf16.msra.mxu1 %v717_v36 }
 0x117   :  { %670 = vmatprep.subr.bf16.mxu1 %v792_v0 }
 0x11a   :  { %671 = vmatpush3.bf16.msra.mxu1 %v718_v37 }
 0x11b   :  { %672 = vmatprep.subr.bf16.mxu1 %v792_v0 }
 0x11e   :  { %673 = vmatpush3.bf16.msra.mxu1 %v719_v38 }
 0x11f   :  { %674 = vmatprep.subr.bf16.mxu1 %v792_v0 }
 0x122   :  { %675 = vmatpush3.bf16.msra.mxu1 %v720_v39 }
 0x123   :  { %676 = vmatprep.subr.bf16.mxu1 %v792_v0 }
 0x126   :  { %677 = vmatpush3.bf16.msra.mxu1 %v721_v48 }
 0x127   :  { %678 = vmatprep.subr.bf16.mxu1 %v792_v0 }
 0x12a   :  { %679 = vmatpush3.bf16.msra.mxu1 %v722_v49 }
 0x1cd   :  { %v293_v41 = vpop.f32.mrf.mxu1 }
 0x1ce   :  { %v294_v42 = vadd.f32 %v541_v40, %v293_v41 }
 0x1cf   :  { %v642_v43 = vpop.f32.mrf.mxu1 }
 0x1d0   :  { %v299_v44 = vmax.f32 %v294_v42, 0.0 }
 0x1d1   :  { %v296_v45 = vpop.f32.mrf.mxu1 }
 0x1d2   :  { %v300_v46 = vpack.c.bf16 %v299_v44, %v299_v44 }
 0x1d3   :  { %v643_v47 = vpop.f32.mrf.mxu1 }
 0x1d4   :  { %661 = vmatmul.mubr.bf16.vlgmr.msra.gmra.mxu0 %v300_v46 }
 0x294   :  { %v406_v51 = vpop.f32.mrf.mxu0 }
 0x295   :  { %v407_v52 = vadd.f32 %v550_v50, %v406_v51 }
 0x296   :  { %v662_v53 = vpop.f32.mrf.mxu0 }
 0x297   :  { %v412_v54 = vmax.f32 %v407_v52, 0.0 }
 0x298   :  { %v409_v55 = vpop.f32.mrf.mxu0 }
 0x299   :  { %v413_v56 = vpack.c.bf16 %v412_v54, %v412_v54 }
 0x29a   :  { %v663_v57 = vpop.f32.mrf.mxu0 }
 0x29b   :  { %681 = vmatmul.mubr.bf16.vlgmr.msra.gmra.mxu1 %v413_v56 }
 0x35b   :  { %v519_v59 = vpop.f32.mrf.mxu1 }
 0x35c   :  { %v520_v60 = vadd.f32 %v559_v58, %v519_v59 }
 0x35d   :  { %v682_v61 = vpop.f32.mrf.mxu1 }
 0x35e   :  { %525 = vst [vmem:[%s944_s9] sm:$0xff] %v520_v60 }
 0x35f   :  { %v522_v62 = vpop.f32.mrf.mxu1 }
 0x361   :  { %v683_v63 = vpop.f32.mrf.mxu1 }
 0x362   :  { %530 = vsyncpa [#allocation3], 1 }
 0x363   :  { %531 = vsyncpa [#allocation5], 1 }

</bundles_post_ra>
